<compile_context>
chip_gen: v5e
topology: v5e:2x2
jax: 0.10.0
libtpu: 0.0.40
codegen_flags: <defaults>
</compile_context>

<pallas_src>
import functools

import jax
import jax.numpy as jnp
from jax import lax
from jax.experimental import pallas as pl
from jax.experimental.pallas import tpu as pltpu


def _round_up(x, m):
    return (x + m - 1) // m * m


def _lora_linear_kernel(x_ref, w_ref, b_ref, a_ref, bsc_ref, o_ref,
                        acc_ref, lora_ref):
    """One (i, j, k) grid step of the fused base-linear + LoRA matmul.

    x_ref   : (tm, tk)     activation tile (bf16)
    w_ref   : (tn, tk)     base weight tile, native (d_out, d_in) layout (bf16)
    b_ref   : (1, tn)      base bias tile (f32)
    a_ref   : (r_pad, tk)  lora_A tile, native (r, d_in) layout, rank-padded (bf16)
    bsc_ref : (tn, r_pad)  lora_B tile, native (d_out, r) layout, pre-scaled (bf16)
    o_ref   : (tm, tn)     output tile
    acc_ref : (tm, tn)     f32 accumulator scratch
    lora_ref: (tm, r_pad)  f32 low-rank scratch (reused across the N axis)
    """
    j = pl.program_id(1)
    k = pl.program_id(2)

    # Init: fold the bias directly into the accumulator on the first K step.
    @pl.when(k == 0)
    def _():
        acc_ref[...] = jnp.broadcast_to(b_ref[...], acc_ref.shape)

    @pl.when((j == 0) & (k == 0))
    def _():
        lora_ref[...] = jnp.zeros_like(lora_ref)

    x = x_ref[...]

    # Base path: contract the shared K (d_in) axis of x and W without any
    # transposed copies: (tm, tk) . (tn, tk) -> (tm, tn).
    acc_ref[...] += lax.dot_general(
        x, w_ref[...], (((1,), (1,)), ((), ())),
        preferred_element_type=jnp.float32)

    # LoRA low-rank sliver (tm, r_pad): accumulated only on the first N tile
    # of each row block and reused for every other N tile (scratch persists
    # across grid iterations; K is the fastest-varying grid axis).
    @pl.when(j == 0)
    def _():
        lora_ref[...] += lax.dot_general(
            x, a_ref[...], (((1,), (1,)), ((), ())),
            preferred_element_type=jnp.float32)

    # Finalize once per (i, j) tile on the last K step: LoRA up-projection
    # (scaling already folded into B), single cast + lane-dense store.
    @pl.when(k == pl.num_programs(2) - 1)
    def _():
        lora_out = lax.dot_general(
            lora_ref[...].astype(bsc_ref.dtype), bsc_ref[...],
            (((1,), (1,)), ((), ())),
            preferred_element_type=jnp.float32)
        o_ref[...] = (acc_ref[...] + lora_out).astype(o_ref.dtype)


@functools.partial(jax.jit, static_argnames=("r", "lora_alpha", "tm", "tn", "tk"))
def lora_linear_forward(x, weight, bias, lora_A, lora_B, *, r, lora_alpha,
                        tm=512, tn=512, tk=512):
    """Forward of one LoRA-injected nn.Linear.

    x       : (batch, seq, d_in)
    weight  : (d_out, d_in)       PyTorch nn.Linear convention (native layout)
    bias    : (d_out,)
    lora_A  : (r, d_in)
    lora_B  : (d_out, r)
    returns : (batch, seq, d_out)
    """
    orig_dtype = x.dtype
    batch, seq, d_in = x.shape
    d_out, d_in_w = weight.shape
    assert d_in_w == d_in
    scaling = float(lora_alpha) / float(r)

    m = batch * seq

    # Tile selection: respect (8, 128) alignment, cap by the padded dims.
    tm_ = min(tm, _round_up(m, 8))
    tn_ = min(tn, _round_up(d_out, 128))
    tk_ = min(tk, _round_up(d_in, 128))
    mp = _round_up(m, tm_)
    np_ = _round_up(d_out, tn_)
    kp = _round_up(d_in, tk_)
    r_pad = _round_up(max(r, 1), 128)

    # bf16 inputs, f32 accumulation; zero-pad to tile multiples (zeros are
    # harmless for the K contraction, padded rows/cols are sliced off).
    x2 = jnp.pad(x.reshape(m, d_in).astype(jnp.bfloat16),
                 ((0, mp - m), (0, kp - d_in)))
    w_p = jnp.pad(weight.astype(jnp.bfloat16),
                  ((0, np_ - d_out), (0, kp - d_in)))
    a_p = jnp.pad(lora_A.astype(jnp.bfloat16),
                  ((0, r_pad - r), (0, kp - d_in)))
    # Fold scaling = alpha / r into B host-side; pad rank to a full 128 lanes.
    b_p = jnp.pad((lora_B * scaling).astype(jnp.bfloat16),
                  ((0, np_ - d_out), (0, r_pad - r)))
    bias_p = jnp.pad(bias.astype(jnp.float32), (0, np_ - d_out)).reshape(1, np_)

    grid = (mp // tm_, np_ // tn_, kp // tk_)

    out = pl.pallas_call(
        _lora_linear_kernel,
        out_shape=jax.ShapeDtypeStruct((mp, np_), orig_dtype),
        grid_spec=pltpu.PrefetchScalarGridSpec(
            num_scalar_prefetch=0,
            grid=grid,
            in_specs=[
                pl.BlockSpec((tm_, tk_), lambda i, j, k: (i, k)),    # x
                pl.BlockSpec((tn_, tk_), lambda i, j, k: (j, k)),    # W (native)
                pl.BlockSpec((1, tn_), lambda i, j, k: (0, j)),      # bias
                pl.BlockSpec((r_pad, tk_), lambda i, j, k: (0, k)),  # lora_A
                pl.BlockSpec((tn_, r_pad), lambda i, j, k: (j, 0)),  # lora_B*scale
            ],
            out_specs=pl.BlockSpec((tm_, tn_), lambda i, j, k: (i, j)),
            scratch_shapes=[
                pltpu.VMEM((tm_, tn_), jnp.float32),    # base accumulator
                pltpu.VMEM((tm_, r_pad), jnp.float32),  # low-rank accumulator
            ],
        ),
        compiler_params=pltpu.CompilerParams(
            # K is a reduction (output block invariant along K) -> arbitrary.
            # N must stay "arbitrary": the low-rank scratch computed at j == 0
            # is reused by all other j of the same row block, so the N axis
            # cannot be sharded across TensorCores.  M rows are independent.
            dimension_semantics=("parallel", "arbitrary", "arbitrary"),
            vmem_limit_bytes=48 * 1024 * 1024,
        ),
    )(x2, w_p, bias_p, a_p, b_p)

    return out[:m, :d_out].reshape(batch, seq, d_out)


def _reference(x, weight, bias, lora_A, lora_B, *, r, lora_alpha):
    scaling = float(lora_alpha) / float(r)
    base = jnp.einsum("bsi,oi->bso", x, weight) + bias
    lora = jnp.einsum("bsi,ri->bsr", x, lora_A)
    lora = jnp.einsum("bsr,or->bso", lora, lora_B)
    return base + scaling * lora


if __name__ == "__main__":
    # Small shapes consistent with a LoRA-wrapped linear inside a transformer:
    # batch=2, seq=8, hidden=32, r=4, alpha=8.
    batch, seq, hidden, r, alpha = 2, 8, 32, 4, 8

    key = jax.random.PRNGKey(0)
    kx, kw, kb, ka, kb2 = jax.random.split(key, 5)

    x = jax.random.normal(kx, (batch, seq, hidden), dtype=jnp.float32)
    weight = jax.random.normal(kw, (hidden, hidden), dtype=jnp.float32) * 0.05
    bias = jax.random.normal(kb, (hidden,), dtype=jnp.float32) * 0.01
    # Note: default LoRA init zeroes lora_B; we use small random values here so
    # the low-rank path is actually exercised (synthetic, deterministic params).
    lora_A = jax.random.normal(ka, (r, hidden), dtype=jnp.float32) * 0.05
    lora_B = jax.random.normal(kb2, (hidden, r), dtype=jnp.float32) * 0.05

    out = lora_linear_forward(
        x, weight, bias, lora_A, lora_B, r=r, lora_alpha=alpha
    )
    out = jax.block_until_ready(out)

    ref = _reference(x, weight, bias, lora_A, lora_B, r=r, lora_alpha=alpha)
    assert out.shape == (batch, seq, hidden)
    # bf16 inputs / f32 accumulation vs f32 reference -> loosened tolerance.
    assert jnp.allclose(out, ref, atol=2e-2, rtol=2e-2), "mismatch vs reference"

    print("KERNEL_OK")
</pallas_src>

<mosaic_0001>
module attributes {stable_mosaic.version = 11 : i64} {
  func.func @_lora_linear_kernel(%arg0: i32, %arg1: i32, %arg2: i32, %arg3: memref<16x128xbf16, #tpu.memory_space<vmem>>, %arg4: memref<128x128xbf16, #tpu.memory_space<vmem>>, %arg5: memref<1x128xf32, #tpu.memory_space<vmem>>, %arg6: memref<128x128xbf16, #tpu.memory_space<vmem>>, %arg7: memref<128x128xbf16, #tpu.memory_space<vmem>>, %arg8: memref<16x128xf32, #tpu.memory_space<vmem>>, %arg9: memref<16x128xf32, #tpu.memory_space<vmem>>, %arg10: memref<16x128xf32, #tpu.memory_space<vmem>>) attributes {dimension_semantics = [#tpu.dimension_semantics<parallel>, #tpu.dimension_semantics<arbitrary>, #tpu.dimension_semantics<arbitrary>], iteration_bounds = array<i64: 1, 1, 1>, scalar_prefetch = 0 : i64, scratch_operands = 2 : i64, tpu.core_type = #tpu.core_type<tc>, window_params = [{transform_indices = @transform_0, window_bounds = array<i64: 16, 128>}, {transform_indices = @transform_1, window_bounds = array<i64: 128, 128>}, {transform_indices = @transform_2, window_bounds = array<i64: 1, 128>}, {transform_indices = @transform_3, window_bounds = array<i64: 128, 128>}, {transform_indices = @transform_4, window_bounds = array<i64: 128, 128>}, {transform_indices = @transform_5, window_bounds = array<i64: 16, 128>}]} {
    %c0_i32 = arith.constant 0 : i32
    %0 = arith.cmpi eq, %arg2, %c0_i32 : i32
    %1 = arith.extui %0 : i1 to i32
    %c0_i32_0 = arith.constant 0 : i32
    %2 = arith.cmpi ne, %1, %c0_i32_0 : i32
    scf.if %2 {
      %c0_15 = arith.constant 0 : index
      %c0_16 = arith.constant 0 : index
      %20 = vector.load %arg5[%c0_15, %c0_16] : memref<1x128xf32, #tpu.memory_space<vmem>>, vector<1x128xf32>
      %21 = vector.shape_cast %20 : vector<1x128xf32> to vector<1x128xf32>
      %22 = vector.broadcast %21 : vector<1x128xf32> to vector<16x128xf32>
      %c0_17 = arith.constant 0 : index
      %c0_18 = arith.constant 0 : index
      %23 = vector.load %arg9[%c0_17, %c0_18] : memref<16x128xf32, #tpu.memory_space<vmem>>, vector<16x128xf32>
      tpu.vector_store %arg9[%c0_17, %c0_18], %22 {strides = array<i32>} : memref<16x128xf32, #tpu.memory_space<vmem>>, vector<16x128xf32>,
    } else {
    }
    %c0_i32_1 = arith.constant 0 : i32
    %3 = arith.cmpi eq, %arg1, %c0_i32_1 : i32
    %c0_i32_2 = arith.constant 0 : i32
    %4 = arith.cmpi eq, %arg2, %c0_i32_2 : i32
    %5 = arith.andi %3, %4 : i1
    %6 = arith.extui %5 : i1 to i32
    %c0_i32_3 = arith.constant 0 : i32
    %7 = arith.cmpi ne, %6, %c0_i32_3 : i32
    scf.if %7 {
      %cst_15 = arith.constant 0.000000e+00 : f32
      %20 = vector.broadcast %cst_15 : f32 to vector<16x128xf32>
      %c0_16 = arith.constant 0 : index
      %c0_17 = arith.constant 0 : index
      %21 = vector.load %arg10[%c0_16, %c0_17] : memref<16x128xf32, #tpu.memory_space<vmem>>, vector<16x128xf32>
      tpu.vector_store %arg10[%c0_16, %c0_17], %20 {strides = array<i32>} : memref<16x128xf32, #tpu.memory_space<vmem>>, vector<16x128xf32>,
    } else {
    }
    %c0 = arith.constant 0 : index
    %c0_4 = arith.constant 0 : index
    %8 = vector.load %arg3[%c0, %c0_4] : memref<16x128xbf16, #tpu.memory_space<vmem>>, vector<16x128xbf16>
    %c0_5 = arith.constant 0 : index
    %c0_6 = arith.constant 0 : index
    %9 = vector.load %arg9[%c0_5, %c0_6] : memref<16x128xf32, #tpu.memory_space<vmem>>, vector<16x128xf32>
    %c0_7 = arith.constant 0 : index
    %c0_8 = arith.constant 0 : index
    %10 = vector.load %arg4[%c0_7, %c0_8] : memref<128x128xbf16, #tpu.memory_space<vmem>>, vector<128x128xbf16>
    %cst = arith.constant dense<0.000000e+00> : vector<16x128xf32>
    %11 = tpu.matmul %8, %10, %cst {dimension_numbers = #tpu.dot_dimension_numbers<[1], [1], [0], [0], [0, 0, 1, 0], [], []>} : vector<16x128xbf16>, vector<128x128xbf16>, vector<16x128xf32> -> vector<16x128xf32>
    %12 = arith.addf %9, %11 : vector<16x128xf32>
    %c0_9 = arith.constant 0 : index
    %c0_10 = arith.constant 0 : index
    %13 = vector.load %arg9[%c0_9, %c0_10] : memref<16x128xf32, #tpu.memory_space<vmem>>, vector<16x128xf32>
    tpu.vector_store %arg9[%c0_9, %c0_10], %12 {strides = array<i32>} : memref<16x128xf32, #tpu.memory_space<vmem>>, vector<16x128xf32>,
    %c0_i32_11 = arith.constant 0 : i32
    %14 = arith.cmpi eq, %arg1, %c0_i32_11 : i32
    %15 = arith.extui %14 : i1 to i32
    %c0_i32_12 = arith.constant 0 : i32
    %16 = arith.cmpi ne, %15, %c0_i32_12 : i32
    scf.if %16 {
      %c0_15 = arith.constant 0 : index
      %c0_16 = arith.constant 0 : index
      %20 = vector.load %arg10[%c0_15, %c0_16] : memref<16x128xf32, #tpu.memory_space<vmem>>, vector<16x128xf32>
      %c0_17 = arith.constant 0 : index
      %c0_18 = arith.constant 0 : index
      %21 = vector.load %arg6[%c0_17, %c0_18] : memref<128x128xbf16, #tpu.memory_space<vmem>>, vector<128x128xbf16>
      %cst_19 = arith.constant dense<0.000000e+00> : vector<16x128xf32>
      %22 = tpu.matmul %8, %21, %cst_19 {dimension_numbers = #tpu.dot_dimension_numbers<[1], [1], [0], [0], [0, 0, 1, 0], [], []>} : vector<16x128xbf16>, vector<128x128xbf16>, vector<16x128xf32> -> vector<16x128xf32>
      %23 = arith.addf %20, %22 : vector<16x128xf32>
      %c0_20 = arith.constant 0 : index
      %c0_21 = arith.constant 0 : index
      %24 = vector.load %arg10[%c0_20, %c0_21] : memref<16x128xf32, #tpu.memory_space<vmem>>, vector<16x128xf32>
      tpu.vector_store %arg10[%c0_20, %c0_21], %23 {strides = array<i32>} : memref<16x128xf32, #tpu.memory_space<vmem>>, vector<16x128xf32>,
    } else {
    }
    %c0_i32_13 = arith.constant 0 : i32
    %17 = arith.cmpi eq, %arg2, %c0_i32_13 : i32
    %18 = arith.extui %17 : i1 to i32
    %c0_i32_14 = arith.constant 0 : i32
    %19 = arith.cmpi ne, %18, %c0_i32_14 : i32
    scf.if %19 {
      %c0_15 = arith.constant 0 : index
      %c0_16 = arith.constant 0 : index
      %20 = vector.load %arg10[%c0_15, %c0_16] : memref<16x128xf32, #tpu.memory_space<vmem>>, vector<16x128xf32>
      %21 = arith.truncf %20 : vector<16x128xf32> to vector<16x128xbf16>
      %c0_17 = arith.constant 0 : index
      %c0_18 = arith.constant 0 : index
      %22 = vector.load %arg7[%c0_17, %c0_18] : memref<128x128xbf16, #tpu.memory_space<vmem>>, vector<128x128xbf16>
      %cst_19 = arith.constant dense<0.000000e+00> : vector<16x128xf32>
      %23 = tpu.matmul %21, %22, %cst_19 {dimension_numbers = #tpu.dot_dimension_numbers<[1], [1], [0], [0], [0, 0, 1, 0], [], []>} : vector<16x128xbf16>, vector<128x128xbf16>, vector<16x128xf32> -> vector<16x128xf32>
      %c0_20 = arith.constant 0 : index
      %c0_21 = arith.constant 0 : index
      %24 = vector.load %arg9[%c0_20, %c0_21] : memref<16x128xf32, #tpu.memory_space<vmem>>, vector<16x128xf32>
      %25 = arith.addf %24, %23 : vector<16x128xf32>
      %c0_22 = arith.constant 0 : index
      %c0_23 = arith.constant 0 : index
      %26 = vector.load %arg8[%c0_22, %c0_23] : memref<16x128xf32, #tpu.memory_space<vmem>>, vector<16x128xf32>
      tpu.vector_store %arg8[%c0_22, %c0_23], %25 {strides = array<i32>} : memref<16x128xf32, #tpu.memory_space<vmem>>, vector<16x128xf32>,
    } else {
    }
    return
  }
  func.func @transform_0(%arg0: i32, %arg1: i32, %arg2: i32) -> (i32, i32) {
    %c0_i32 = arith.constant 0 : i32
    return %arg0, %arg2 : i32, i32
  }
  func.func @transform_1(%arg0: i32, %arg1: i32, %arg2: i32) -> (i32, i32) {
    %c0_i32 = arith.constant 0 : i32
    return %arg1, %arg2 : i32, i32
  }
  func.func @transform_2(%arg0: i32, %arg1: i32, %arg2: i32) -> (i32, i32) {
    %c0_i32 = arith.constant 0 : i32
    %c0_i32_0 = arith.constant 0 : i32
    return %c0_i32, %arg1 : i32, i32
  }
  func.func @transform_3(%arg0: i32, %arg1: i32, %arg2: i32) -> (i32, i32) {
    %c0_i32 = arith.constant 0 : i32
    %c0_i32_0 = arith.constant 0 : i32
    return %c0_i32, %arg2 : i32, i32
  }
  func.func @transform_4(%arg0: i32, %arg1: i32, %arg2: i32) -> (i32, i32) {
    %c0_i32 = arith.constant 0 : i32
    %c0_i32_0 = arith.constant 0 : i32
    return %arg1, %c0_i32 : i32, i32
  }
  func.func @transform_5(%arg0: i32, %arg1: i32, %arg2: i32) -> (i32, i32) {
    %c0_i32 = arith.constant 0 : i32
    return %arg0, %arg1 : i32, i32
  }
}

</mosaic_0001>

<bundles_post_ra>
// kernel: lora_linear_forward.1
= control target key start
LH: loop header
LB: loop body
LE: loop exit
PB: predicated region body
PF: predicated region fallthrough
CT: control target
= control target key end

     0   :  { %s550_s3 = inlined_call_operand.vmem [shape: bf16[128,128], index: 3, kind: input, shape index: {}]   ;;  %s551_s1 = inlined_call_operand.vmem [shape: bf16[128,128], index: 1, kind: input, shape index: {}]   ;;  %s552_s4 = inlined_call_operand.vmem [shape: bf16[128,128], index: 4, kind: input, shape index: {}]   ;;  %s553_s0 = inlined_call_operand.vmem [shape: bf16[16,128], index: 0, kind: input, shape index: {}]   ;;  %s554_s2 = inlined_call_operand.vmem [shape: f32[1,128], index: 2, kind: input, shape index: {}]   ;;  %s555_s5 = inlined_call_operand.vmem [shape: f32[16,128], index: 5, kind: output, shape index: {}]  }
   0x1   :  { %v426_v0 = vld [vmem:[%s550_s3 + $0x38] sm:$0xff]  ;;  %v425_v1 = vld [vmem:[%s550_s3 + $0x30] sm:$0xff]  ;;  %v424_v2 = vld [vmem:[%s550_s3 + $0x28] sm:$0xff] }
   0x2   :  { %198 = vmatpush.bf16.xpose.msra.mxu1 %v426_v0  ;;  %v423_v3 = vld [vmem:[%s550_s3 + $0x20] sm:$0xff]  ;;  %v422_v4 = vld [vmem:[%s550_s3 + $0x18] sm:$0xff]  ;;  %v421_v7 = vld [vmem:[%s550_s3 + $0x10] sm:$0xff] }
   0x3   :  { %v418_v5 = vld [vmem:[%s551_s1 + $0x38] sm:$0xff]  ;;  %v417_v8 = vld [vmem:[%s551_s1 + $0x30] sm:$0xff]  ;;  %v420_v10 = vld [vmem:[%s550_s3 + $0x8] sm:$0xff] }
   0x4   :  { %v434_v6 = vld [vmem:[%s552_s4 + $0x38] sm:$0xff]  ;;  %111 = vmatpush.bf16.xpose.msra.mxu0 %v418_v5  ;;  %v433_v9 = vld [vmem:[%s552_s4 + $0x30] sm:$0xff]  ;;  %v416_v11 = vld [vmem:[%s551_s1 + $0x28] sm:$0xff] }
   0x5   :  { %286 = vmatpush.bf16.xpose.msra.mxu2 %v434_v6  ;;  %v432_v12 = vld [vmem:[%s552_s4 + $0x28] sm:$0xff]  ;;  %v419_v13 = vld [vmem:[%s550_s3] sm:$0xff]  ;;  %v414_v17 = vld [vmem:[%s551_s1 + $0x18] sm:$0xff] }
   0x6   :  { %v415_v14 = vld [vmem:[%s551_s1 + $0x20] sm:$0xff]  ;;  %v430_v18 = vld [vmem:[%s552_s4 + $0x18] sm:$0xff]  ;;  %v413_v19 = vld [vmem:[%s551_s1 + $0x10] sm:$0xff] }
   0x7   :  { %v431_v15 = vld [vmem:[%s552_s4 + $0x20] sm:$0xff]  ;;  %v429_v20 = vld [vmem:[%s552_s4 + $0x10] sm:$0xff]  ;;  %v412_v21 = vld [vmem:[%s551_s1 + $0x8] sm:$0xff] }
   0x8   :  { %v410_v16 = vld [vmem:[%s553_s0] sm:$0xff]  ;;  %v428_v22 = vld [vmem:[%s552_s4 + $0x8] sm:$0xff] }
   0x9   :  { %v411_v23 = vld [vmem:[%s551_s1] sm:$0xff] }
   0xa   :  { %199 = vmatpush.bf16.xpose.msra.mxu1 %v425_v1  ;;  %v427_v24 = vld [vmem:[%s552_s4] sm:$0xff] }
   0xb   :  { %v435_v28 = vld [vmem:[%s554_s2] ss:$0 sm:$0xff] }
   0xc   :  { %112 = vmatpush.bf16.xpose.msra.mxu0 %v417_v8 }
   0xd   :  { %287 = vmatpush.bf16.xpose.msra.mxu2 %v433_v9 }
  0x12   :  { %200 = vmatpush.bf16.xpose.msra.mxu1 %v424_v2 }
  0x14   :  { %113 = vmatpush.bf16.xpose.msra.mxu0 %v416_v11 }
  0x15   :  { %288 = vmatpush.bf16.xpose.msra.mxu2 %v432_v12 }
  0x1a   :  { %201 = vmatpush.bf16.xpose.msra.mxu1 %v423_v3 }
  0x1c   :  { %114 = vmatpush.bf16.xpose.msra.mxu0 %v415_v14 }
  0x1d   :  { %289 = vmatpush.bf16.xpose.msra.mxu2 %v431_v15 }
  0x22   :  { %202 = vmatpush.bf16.xpose.msra.mxu1 %v422_v4 }
  0x24   :  { %115 = vmatpush.bf16.xpose.msra.mxu0 %v414_v17 }
  0x25   :  { %290 = vmatpush.bf16.xpose.msra.mxu2 %v430_v18 }
  0x2a   :  { %203 = vmatpush.bf16.xpose.msra.mxu1 %v421_v7 }
  0x2c   :  { %116 = vmatpush.bf16.xpose.msra.mxu0 %v413_v19 }
  0x2d   :  { %291 = vmatpush.bf16.xpose.msra.mxu2 %v429_v20 }
  0x32   :  { %204 = vmatpush.bf16.xpose.msra.mxu1 %v420_v10 }
  0x34   :  { %117 = vmatpush.bf16.xpose.msra.mxu0 %v412_v21 }
  0x35   :  { %292 = vmatpush.bf16.xpose.msra.mxu2 %v428_v22 }
  0x3a   :  { %205 = vmatpush.bf16.xpose.msra.mxu1 %v419_v13 }
  0x3c   :  { %118 = vmatpush.bf16.xpose.msra.mxu0 %v411_v23 }
  0x3d   :  { %293 = vmatpush.bf16.xpose.msra.mxu2 %v427_v24 }
  0x41   :  { %206 = vmatmul.bf16.vlgmr.msra.gmra.mxu1 %v410_v16 }
  0x43   :  { %119 = vmatmul.bf16.vlgmr.msra.gmra.mxu0 %v410_v16 }
  0xbe   :  { %v207_v25 = vpop.f32.mrf.mxu1 }
  0xc0   :  { %v120_v29 = vpop.f32.mrf.mxu0 }
  0xc1   :  { %v125_v30 = vadd.f32 %v435_v28, %v120_v29 }
  0xc6   :  { %v209_v26 = vpop.f32.mrf.mxu1 }
  0xc7   :  { %v221_v27 = vpack.c.bf16 %v209_v26, %v207_v25 }
  0xc8   :  { %v122_v33 = vpop.f32.mrf.mxu0 }
  0xc9   :  { %294 = vmatmul.bf16.vlgmr.msra.gmra.mxu2 %v221_v27  ;;  %v126_v34 = vadd.f32 %v435_v28, %v122_v33 }
 0x14c   :  { %v295_v31 = vpop.f32.mrf.mxu2 }
 0x14d   :  { %v302_v32 = vadd.f32 %v295_v31, %v125_v30 }
 0x14f   :  { %304 = vst [vmem:[%s555_s5] sm:$0xff] %v302_v32 }
 0x154   :  { %v297_v35 = vpop.f32.mrf.mxu2 }
 0x155   :  { %v303_v36 = vadd.f32 %v297_v35, %v126_v34 }
 0x157   :  { %305 = vst [vmem:[%s555_s5 + $0x8] sm:$0xff] %v303_v36 }

</bundles_post_ra>
